<compile_context>
chip_gen: v5e
topology: v5e:2x2
jax: 0.10.0
libtpu: 0.0.40
codegen_flags: <defaults>
</compile_context>

<pallas_src>
import functools

import jax
import jax.numpy as jnp
from jax.experimental import pallas as pl
from jax.experimental.pallas import tpu as pltpu


def _round_up(n, m):
    return ((n + m - 1) // m) * m


def rbfn_kernel(x_ref, c_t_ref, c2_ref, gamma_ref, w_ref, b_ref, out_ref,
                acc_ref, x2_ref, *, apply_softmax, matmul_dtype):
    """Grid = (batch tiles, D tiles).

    x_ref:     (TB, TD)  flattened input tile
    c_t_ref:   (TD, Kp)  centers, transposed, D-tile
    c2_ref:    (1, Kp)   precomputed ||c||^2   (padded lanes = 0)
    gamma_ref: (1, Kp)   precomputed -0.5/sigma^2
    w_ref:     (Kp, Op)  linear weight, transposed (padded rows/cols = 0)
    b_ref:     (1, Op)   linear bias (padded lanes = -1e30)
    out_ref:   (TB, Op)
    acc_ref:   (TB, Kp)  f32 scratch: running x . c^T
    x2_ref:    (TB, 1)   f32 scratch: running ||x||^2
    """
    d = pl.program_id(1)
    nd = pl.num_programs(1)

    @pl.when(d == 0)
    def _init():
        acc_ref[...] = jnp.zeros_like(acc_ref)
        x2_ref[...] = jnp.zeros_like(x2_ref)

    x = x_ref[...].astype(jnp.float32)                       # (TB, TD)

    # Partial x . c^T on the MXU, accumulated over D tiles (f32 accumulator).
    acc_ref[...] += jnp.dot(x.astype(matmul_dtype),
                            c_t_ref[...].astype(matmul_dtype),
                            preferred_element_type=jnp.float32)
    # Partial ||x||^2 (lane reduce), accumulated over D tiles, f32.
    x2_ref[...] += jnp.sum(x * x, axis=-1, keepdims=True)    # (TB, 1)

    @pl.when(d == nd - 1)
    def _finalize():
        c2 = c2_ref[...].astype(jnp.float32)                 # (1, Kp)
        gamma = gamma_ref[...].astype(jnp.float32)           # (1, Kp)
        sq_dist = jnp.maximum(x2_ref[...] + c2 - 2.0 * acc_ref[...], 0.0)
        gauss = jnp.exp(sq_dist * gamma)                     # EUP; no divide on hot path

        y = jnp.dot(gauss, w_ref[...].astype(jnp.float32),
                    preferred_element_type=jnp.float32)      # (TB, Op) -> MXU
        y = y + b_ref[...].astype(jnp.float32)

        if apply_softmax:  # static Python branch (out_dim == 2 in the module)
            m = jnp.max(y, axis=-1, keepdims=True)
            e = jnp.exp(y - m)                               # padded lanes -> exp(-1e30) = 0
            y = e / jnp.sum(e, axis=-1, keepdims=True)

        out_ref[...] = y.astype(out_ref.dtype)


def rbfn_forward(X, centers, sigma, w, b, *, batch_tile=128, d_tile=512,
                 matmul_dtype=jnp.float32):
    """X: (B, C, H, W) NCHW.  centers: (K, D).  sigma: (K,).  w: (O, K).  b: (O,)."""
    B = X.shape[0]
    x = X.reshape(B, -1).astype(jnp.float32)                 # nn.Flatten()
    D = x.shape[1]
    K = centers.shape[0]
    O = w.shape[0]

    # ---- padded, lane-dense layouts -------------------------------------
    Kp = _round_up(K, 128)
    Op = _round_up(O, 128)
    TB = batch_tile if B >= batch_tile else _round_up(max(B, 1), 8)
    Bp = _round_up(B, TB)
    TD = d_tile if D >= d_tile else _round_up(D, 128)
    Dp = _round_up(D, TD)

    NEG = jnp.float32(-1e30)

    x_p = jnp.zeros((Bp, Dp), jnp.float32).at[:B, :D].set(x)
    c_t = jnp.zeros((Dp, Kp), jnp.float32).at[:D, :K].set(
        centers.T.astype(jnp.float32))                       # (Dp, Kp)
    c2 = jnp.sum(c_t * c_t, axis=0, keepdims=True)           # (1, Kp), padded lanes = 0
    gamma = jnp.full((1, Kp), -1.0, jnp.float32).at[0, :K].set(
        -0.5 / (sigma.astype(jnp.float32) ** 2))             # precomputed -1/(2 sigma^2)
    w_t = jnp.zeros((Kp, Op), jnp.float32).at[:K, :O].set(w.T.astype(jnp.float32))
    b_p = jnp.full((1, Op), NEG, jnp.float32).at[0, :O].set(b.astype(jnp.float32))

    nb = Bp // TB
    nd = Dp // TD

    kernel = functools.partial(rbfn_kernel,
                               apply_softmax=(O == 2),
                               matmul_dtype=matmul_dtype)

    cost = pl.CostEstimate(
        flops=int(2 * Bp * Dp * Kp + 2 * Bp * Kp * Op),
        transcendentals=int(Bp * Kp),
        bytes_accessed=int(4 * (Bp * Dp + Dp * Kp + Kp * Op + Bp * Op + 3 * Kp)),
    )

    out_p = pl.pallas_call(
        kernel,
        out_shape=jax.ShapeDtypeStruct((Bp, Op), jnp.float32),
        grid_spec=pltpu.PrefetchScalarGridSpec(
            num_scalar_prefetch=0,
            grid=(nb, nd),
            in_specs=[
                pl.BlockSpec((TB, TD), lambda i, d: (i, d)),   # x tile
                pl.BlockSpec((TD, Kp), lambda i, d: (d, 0)),   # centers^T tile
                pl.BlockSpec((1, Kp), lambda i, d: (0, 0)),    # ||c||^2 (resident)
                pl.BlockSpec((1, Kp), lambda i, d: (0, 0)),    # gamma   (resident)
                pl.BlockSpec((Kp, Op), lambda i, d: (0, 0)),   # W^T     (resident)
                pl.BlockSpec((1, Op), lambda i, d: (0, 0)),    # bias    (resident)
            ],
            out_specs=pl.BlockSpec((TB, Op), lambda i, d: (i, 0)),
            scratch_shapes=[
                pltpu.VMEM((TB, Kp), jnp.float32),             # x.c accumulator
                pltpu.VMEM((TB, 1), jnp.float32),              # ||x||^2 accumulator
            ],
        ),
        compiler_params=pltpu.CompilerParams(
            dimension_semantics=("parallel", "arbitrary"),
            vmem_limit_bytes=32 * 1024 * 1024,                 # fits v7x's 64 MiB VMEM
        ),
        cost_estimate=cost,
    )(x_p, c_t, c2, gamma, w_t, b_p)

    return out_p[:B, :O]


def rbfn_reference(X, centers, sigma, w, b):
    """Pure-JAX reference mirroring the PyTorch forward."""
    B = X.shape[0]
    x = X.reshape(B, -1)
    dist = jnp.sqrt(jnp.maximum(
        jnp.sum(x * x, -1, keepdims=True)
        + jnp.sum(centers * centers, -1)[None, :]
        - 2.0 * x @ centers.T, 0.0))
    gauss = jnp.exp(-dist ** 2 / (2.0 * sigma[None, :] ** 2))
    y = gauss @ w.T + b[None, :]
    if w.shape[0] == 2:
        y = jax.nn.softmax(y, axis=1)
    return y


if __name__ == "__main__":
    # Small deterministic problem: B=2, C=4, H=W=16  ->  D=1024, K=32, out_dim=2
    B, C, H, W = 2, 4, 16, 16
    D = C * H * W
    K = 32          # centers_dim
    OUT_DIM = 2

    key = jax.random.PRNGKey(0)
    k_x, k_c, k_s, k_w, k_b = jax.random.split(key, 5)

    X = jax.random.normal(k_x, (B, C, H, W), dtype=jnp.float32)
    centers = jax.random.normal(k_c, (K, D), dtype=jnp.float32)
    # sigma ~ sqrt(D): keeps the gaussians in a non-degenerate range for the test
    sigma = jnp.sqrt(jnp.float32(D)) * (
        1.0 + jax.random.uniform(k_s, (K,), dtype=jnp.float32))
    lin_w = jax.random.normal(k_w, (OUT_DIM, K), dtype=jnp.float32) / jnp.sqrt(K)
    lin_b = jax.random.normal(k_b, (OUT_DIM,), dtype=jnp.float32) * 0.01

    ref = rbfn_reference(X, centers, sigma, lin_w, lin_b)

    # f32 MXU path (exact validation)
    out = rbfn_forward(X, centers, sigma, lin_w, lin_b)
    out = jax.block_until_ready(out)
    assert out.shape == (B, OUT_DIM)
    assert jnp.allclose(out, ref, atol=1e-5, rtol=1e-5), (out, ref)

    # bf16 MXU fast path (v5e/v6e/v7x); elementwise math stays f32
    out_bf16 = rbfn_forward(X, centers, sigma, lin_w, lin_b,
                            matmul_dtype=jnp.bfloat16)
    out_bf16 = jax.block_until_ready(out_bf16)
    assert jnp.allclose(out_bf16, ref, atol=2e-3, rtol=1e-3), (out_bf16, ref)

    print("KERNEL_OK")
</pallas_src>

<mosaic_0001>
module attributes {stable_mosaic.version = 11 : i64} {
  func.func @rbfn_kernel(%arg0: i32, %arg1: i32, %arg2: memref<8x512xf32, #tpu.memory_space<vmem>>, %arg3: memref<512x128xf32, #tpu.memory_space<vmem>>, %arg4: memref<1x128xf32, #tpu.memory_space<vmem>>, %arg5: memref<1x128xf32, #tpu.memory_space<vmem>>, %arg6: memref<128x128xf32, #tpu.memory_space<vmem>>, %arg7: memref<1x128xf32, #tpu.memory_space<vmem>>, %arg8: memref<8x128xf32, #tpu.memory_space<vmem>>, %arg9: memref<8x128xf32, #tpu.memory_space<vmem>>, %arg10: memref<8x1xf32, #tpu.memory_space<vmem>>) attributes {dimension_semantics = [#tpu.dimension_semantics<parallel>, #tpu.dimension_semantics<arbitrary>], iteration_bounds = array<i64: 1, 2>, scalar_prefetch = 0 : i64, scratch_operands = 2 : i64, tpu.core_type = #tpu.core_type<tc>, window_params = [{transform_indices = @transform_0, window_bounds = array<i64: 8, 512>}, {transform_indices = @transform_1, window_bounds = array<i64: 512, 128>}, {pipeline_mode = #tpu.pipeline_mode<synchronous>, transform_indices = @transform_2, window_bounds = array<i64: 1, 128>}, {pipeline_mode = #tpu.pipeline_mode<synchronous>, transform_indices = @transform_3, window_bounds = array<i64: 1, 128>}, {pipeline_mode = #tpu.pipeline_mode<synchronous>, transform_indices = @transform_4, window_bounds = array<i64: 128, 128>}, {pipeline_mode = #tpu.pipeline_mode<synchronous>, transform_indices = @transform_5, window_bounds = array<i64: 1, 128>}, {transform_indices = @transform_6, window_bounds = array<i64: 8, 128>}]} {
    %c0_i32 = arith.constant 0 : i32
    %0 = arith.cmpi eq, %arg1, %c0_i32 : i32
    %1 = arith.extui %0 : i1 to i32
    %c0_i32_0 = arith.constant 0 : i32
    %2 = arith.cmpi ne, %1, %c0_i32_0 : i32
    scf.if %2 {
      %cst_14 = arith.constant 0.000000e+00 : f32
      %18 = vector.broadcast %cst_14 : f32 to vector<8x128xf32>
      %c0_15 = arith.constant 0 : index
      %c0_16 = arith.constant 0 : index
      %19 = vector.load %arg9[%c0_15, %c0_16] : memref<8x128xf32, #tpu.memory_space<vmem>>, vector<8x128xf32>
      tpu.vector_store %arg9[%c0_15, %c0_16], %18 {strides = array<i32>} : memref<8x128xf32, #tpu.memory_space<vmem>>, vector<8x128xf32>,
      %cst_17 = arith.constant 0.000000e+00 : f32
      %20 = vector.broadcast %cst_17 : f32 to vector<8x1xf32>
      %c0_18 = arith.constant 0 : index
      %c0_19 = arith.constant 0 : index
      %21 = vector.load %arg10[%c0_18, %c0_19] : memref<8x1xf32, #tpu.memory_space<vmem>>, vector<8x1xf32>
      tpu.vector_store %arg10[%c0_18, %c0_19], %20 {strides = array<i32>} : memref<8x1xf32, #tpu.memory_space<vmem>>, vector<8x1xf32>,
    } else {
    }
    %c0 = arith.constant 0 : index
    %c0_1 = arith.constant 0 : index
    %3 = vector.load %arg2[%c0, %c0_1] : memref<8x512xf32, #tpu.memory_space<vmem>>, vector<8x512xf32>
    %c0_2 = arith.constant 0 : index
    %c0_3 = arith.constant 0 : index
    %4 = vector.load %arg9[%c0_2, %c0_3] : memref<8x128xf32, #tpu.memory_space<vmem>>, vector<8x128xf32>
    %c0_4 = arith.constant 0 : index
    %c0_5 = arith.constant 0 : index
    %5 = vector.load %arg3[%c0_4, %c0_5] : memref<512x128xf32, #tpu.memory_space<vmem>>, vector<512x128xf32>
    %cst = arith.constant dense<0.000000e+00> : vector<8x128xf32>
    %6 = tpu.matmul %3, %5, %cst {dimension_numbers = #tpu.dot_dimension_numbers<[1], [0], [0], [1], [0, 0, 1, 1], [], []>} : vector<8x512xf32>, vector<512x128xf32>, vector<8x128xf32> -> vector<8x128xf32>
    %7 = arith.addf %4, %6 : vector<8x128xf32>
    %c0_6 = arith.constant 0 : index
    %c0_7 = arith.constant 0 : index
    %8 = vector.load %arg9[%c0_6, %c0_7] : memref<8x128xf32, #tpu.memory_space<vmem>>, vector<8x128xf32>
    tpu.vector_store %arg9[%c0_6, %c0_7], %7 {strides = array<i32>} : memref<8x128xf32, #tpu.memory_space<vmem>>, vector<8x128xf32>,
    %c0_8 = arith.constant 0 : index
    %c0_9 = arith.constant 0 : index
    %9 = vector.load %arg10[%c0_8, %c0_9] : memref<8x1xf32, #tpu.memory_space<vmem>>, vector<8x1xf32>
    %10 = arith.mulf %3, %3 : vector<8x512xf32>
    %cst_10 = arith.constant dense<0.000000e+00> : vector<8xf32>
    %11 = vector.multi_reduction <add>, %10, %cst_10 [1] : vector<8x512xf32> to vector<8xf32>
    %12 = vector.shape_cast %11 : vector<8xf32> to vector<8x1xf32>
    %13 = arith.addf %9, %12 : vector<8x1xf32>
    %c0_11 = arith.constant 0 : index
    %c0_12 = arith.constant 0 : index
    %14 = vector.load %arg10[%c0_11, %c0_12] : memref<8x1xf32, #tpu.memory_space<vmem>>, vector<8x1xf32>
    tpu.vector_store %arg10[%c0_11, %c0_12], %13 {strides = array<i32>} : memref<8x1xf32, #tpu.memory_space<vmem>>, vector<8x1xf32>,
    %c1_i32 = arith.constant 1 : i32
    %15 = arith.cmpi eq, %arg1, %c1_i32 : i32
    %16 = arith.extui %15 : i1 to i32
    %c0_i32_13 = arith.constant 0 : i32
    %17 = arith.cmpi ne, %16, %c0_i32_13 : i32
    scf.if %17 {
      %c0_14 = arith.constant 0 : index
      %c0_15 = arith.constant 0 : index
      %18 = vector.load %arg4[%c0_14, %c0_15] : memref<1x128xf32, #tpu.memory_space<vmem>>, vector<1x128xf32>
      %c0_16 = arith.constant 0 : index
      %c0_17 = arith.constant 0 : index
      %19 = vector.load %arg5[%c0_16, %c0_17] : memref<1x128xf32, #tpu.memory_space<vmem>>, vector<1x128xf32>
      %c0_18 = arith.constant 0 : index
      %c0_19 = arith.constant 0 : index
      %20 = vector.load %arg10[%c0_18, %c0_19] : memref<8x1xf32, #tpu.memory_space<vmem>>, vector<8x1xf32>
      %21 = vector.broadcast %20 : vector<8x1xf32> to vector<8x128xf32>
      %22 = vector.broadcast %18 : vector<1x128xf32> to vector<8x128xf32>
      %23 = arith.addf %21, %22 : vector<8x128xf32>
      %c0_20 = arith.constant 0 : index
      %c0_21 = arith.constant 0 : index
      %24 = vector.load %arg9[%c0_20, %c0_21] : memref<8x128xf32, #tpu.memory_space<vmem>>, vector<8x128xf32>
      %cst_22 = arith.constant 2.000000e+00 : f32
      %25 = vector.broadcast %cst_22 : f32 to vector<8x128xf32>
      %26 = arith.mulf %25, %24 : vector<8x128xf32>
      %27 = arith.subf %23, %26 : vector<8x128xf32>
      %cst_23 = arith.constant 0.000000e+00 : f32
      %28 = vector.broadcast %cst_23 : f32 to vector<8x128xf32>
      %29 = arith.maximumf %27, %28 : vector<8x128xf32>
      %30 = vector.broadcast %19 : vector<1x128xf32> to vector<8x128xf32>
      %31 = arith.mulf %29, %30 : vector<8x128xf32>
      %32 = math.exp %31 : vector<8x128xf32>
      %c0_24 = arith.constant 0 : index
      %c0_25 = arith.constant 0 : index
      %33 = vector.load %arg6[%c0_24, %c0_25] : memref<128x128xf32, #tpu.memory_space<vmem>>, vector<128x128xf32>
      %cst_26 = arith.constant dense<0.000000e+00> : vector<8x128xf32>
      %34 = tpu.matmul %32, %33, %cst_26 {dimension_numbers = #tpu.dot_dimension_numbers<[1], [0], [0], [1], [0, 0, 1, 1], [], []>} : vector<8x128xf32>, vector<128x128xf32>, vector<8x128xf32> -> vector<8x128xf32>
      %c0_27 = arith.constant 0 : index
      %c0_28 = arith.constant 0 : index
      %35 = vector.load %arg7[%c0_27, %c0_28] : memref<1x128xf32, #tpu.memory_space<vmem>>, vector<1x128xf32>
      %36 = vector.broadcast %35 : vector<1x128xf32> to vector<8x128xf32>
      %37 = arith.addf %34, %36 : vector<8x128xf32>
      %cst_29 = arith.constant dense<0xFF800000> : vector<8xf32>
      %38 = vector.multi_reduction <maximumf>, %37, %cst_29 [1] : vector<8x128xf32> to vector<8xf32>
      %39 = vector.shape_cast %38 : vector<8xf32> to vector<8x1xf32>
      %40 = vector.broadcast %39 : vector<8x1xf32> to vector<8x128xf32>
      %41 = arith.subf %37, %40 : vector<8x128xf32>
      %42 = math.exp %41 : vector<8x128xf32>
      %cst_30 = arith.constant dense<0.000000e+00> : vector<8xf32>
      %43 = vector.multi_reduction <add>, %42, %cst_30 [1] : vector<8x128xf32> to vector<8xf32>
      %44 = vector.shape_cast %43 : vector<8xf32> to vector<8x1xf32>
      %45 = vector.broadcast %44 : vector<8x1xf32> to vector<8x128xf32>
      %46 = arith.divf %42, %45 : vector<8x128xf32>
      %c0_31 = arith.constant 0 : index
      %c0_32 = arith.constant 0 : index
      %47 = vector.load %arg8[%c0_31, %c0_32] : memref<8x128xf32, #tpu.memory_space<vmem>>, vector<8x128xf32>
      tpu.vector_store %arg8[%c0_31, %c0_32], %46 {strides = array<i32>} : memref<8x128xf32, #tpu.memory_space<vmem>>, vector<8x128xf32>,
    } else {
    }
    return
  }
  func.func @transform_0(%arg0: i32, %arg1: i32) -> (i32, i32) {
    %c0_i32 = arith.constant 0 : i32
    return %arg0, %arg1 : i32, i32
  }
  func.func @transform_1(%arg0: i32, %arg1: i32) -> (i32, i32) {
    %c0_i32 = arith.constant 0 : i32
    %c0_i32_0 = arith.constant 0 : i32
    return %arg1, %c0_i32 : i32, i32
  }
  func.func @transform_2(%arg0: i32, %arg1: i32) -> (i32, i32) {
    %c0_i32 = arith.constant 0 : i32
    %c0_i32_0 = arith.constant 0 : i32
    %c0_i32_1 = arith.constant 0 : i32
    return %c0_i32, %c0_i32_0 : i32, i32
  }
  func.func @transform_3(%arg0: i32, %arg1: i32) -> (i32, i32) {
    %c0_i32 = arith.constant 0 : i32
    %c0_i32_0 = arith.constant 0 : i32
    %c0_i32_1 = arith.constant 0 : i32
    return %c0_i32, %c0_i32_0 : i32, i32
  }
  func.func @transform_4(%arg0: i32, %arg1: i32) -> (i32, i32) {
    %c0_i32 = arith.constant 0 : i32
    %c0_i32_0 = arith.constant 0 : i32
    %c0_i32_1 = arith.constant 0 : i32
    return %c0_i32, %c0_i32_0 : i32, i32
  }
  func.func @transform_5(%arg0: i32, %arg1: i32) -> (i32, i32) {
    %c0_i32 = arith.constant 0 : i32
    %c0_i32_0 = arith.constant 0 : i32
    %c0_i32_1 = arith.constant 0 : i32
    return %c0_i32, %c0_i32_0 : i32, i32
  }
  func.func @transform_6(%arg0: i32, %arg1: i32) -> (i32, i32) {
    %c0_i32 = arith.constant 0 : i32
    %c0_i32_0 = arith.constant 0 : i32
    return %arg0, %c0_i32 : i32, i32
  }
}

</mosaic_0001>

<bundles_post_ra>
// kernel: tpu_custom_call.1
= control target key start
LH: loop header
LB: loop body
LE: loop exit
PB: predicated region body
PF: predicated region fallthrough
CT: control target
= control target key end

     0   :  { %s1256_s0 = inlined_call_operand.hbm [shape: f32[8,1024], index: 0, kind: input, shape index: {}]   ;;  %s1257_s1 = inlined_call_operand.hbm [shape: f32[1024,128], index: 1, kind: input, shape index: {}]   ;;  %s1258_s2 = inlined_call_operand.vmem [shape: f32[1,128], index: 2, kind: input, shape index: {}]   ;;  %s1259_s3 = inlined_call_operand.vmem [shape: f32[1,128], index: 3, kind: input, shape index: {}]   ;;  %s1260_s4 = inlined_call_operand.hbm [shape: f32[128,128], index: 4, kind: input, shape index: {}]   ;;  %s1261_s5 = inlined_call_operand.vmem [shape: f32[1,128], index: 5, kind: input, shape index: {}]   ;;  %s1262_s6 = inlined_call_operand.hbm [shape: f32[8,128], index: 6, kind: output, shape index: {}]  }
   0x1   :  { %1267 = sst [smem:[#allocation18_spill]] %s1260_s4 }
   0x2   :  { %11 = vsyncpa [#allocation5], 0 }
   0x3   :  { %13 = vsyncpa [#allocation5 + $0x1], 0 }
   0x4   :  { %14 = vsyncpa [#allocation8], 0 }
   0x5   :  { %16 = vsyncpa [#allocation8 + $0x1], 0 }
   0x6   :  { %17 = vsyncpa [#allocation6], 0  ;;  %s1043_s21 = smov 0   ;;  %s1045_s22 = smov 0  }
   0x7   :  { %s1047_s23 = smov 0   ;;  %s1049_s24 = smov 0  }
   0x8   :  { %s1051_s25 = smov 0   ;;  %s1053_s26 = smov 0  }
   0x9 LB: > { %1268 = sst [smem:[#allocation15_spill]] %s988_s23  ;;  %s1074_s27 = sadd.s32 4294967295, %s1000_s26   ;;  %s1000_s26 = sphi %s1053_s26, %s23_s26   ;;  %s996_s25 = sphi %s1051_s25, %s1283_s25   ;;  %s992_s24 = sphi %s1049_s24, %s1282_s24   ;;  %s988_s23 = sphi %s1047_s23, %s1278_s23   ;;  %s984_s22 = sphi %s1045_s22, %s1281_s22   ;;  %s980_s21 = sphi %s1043_s21, %s1280_s21  }
   0xa   : > { %p707_p0 = scmp.ge.s32.totalorder %s1000_s26, 1  ;;  %p58_p1 = scmp.eq.s32.totalorder %s1074_s27, 0 }
   0xb   : > { %p204_p2 = scmp.lt.s32.totalorder %s1000_s26, 3  ;;  %s1269_s4 = sld [smem:[#allocation18_spill]] }
   0xc   : > { %s1002_s8 = smov [#allocation9]   ;;  %s1263_s10 = smov 128  }
   0xd   : > { %p1082_p3 = pnand %p707_p0, %p204_p2  ;;  %s223_s9 = sshll.u32 %s1002_s8, 4  ;;  %s224_s9 = int_to_ptr.vmem [resolvable:$true] %s223_s9 }
   0xe   : > { %s1264_s11 = smov 8   ;;  %s32_s12 = sadd.s32 1, %s996_s25 }
   0xf   : > { %p740_p4 = pneg %p1082_p3  ;;  %p33_p6 = scmp.ge.s32.totalorder %s32_s12, 2 }
  0x10   : > { %s44_s13 = sadd.s32 1, %s988_s23  ;;  %p51_p7 = scmp.ne.s32.totalorder %s988_s23, %s984_s22 }
  0x11   : > { %s221_s30 = sshll.u32 %s1269_s4, 4  ;;  %p741_p5 = pnand %p740_p4, %p58_p1  ;;  %s222_s30 = int_to_ptr.hbm [resolvable:$true] %s221_s30 }
  0x12   : > { %p52_p8 = scmp.eq.s32.totalorder %s1000_s26, 0  ;;  %s1285_s12 = smov (%p33_p6, %s32_s12), 0 }
  0x13   : > { %743 = dma.hbm_to_vmem [thread:$0]  (!%p741_p5), %s222_s30, 2048, %s224_s9, [#allocation8], %s1263_s10, %s1263_s10, %s1264_s11  }
  0x14   : > { %1271 = sst [smem:[#allocation16_spill]] %s1285_s12  ;;  %p1100_p9 = por %p52_p8, %p51_p7 }
  0x15   : > { %p57_p10 = scmp.ne.s32.totalorder %s984_s22, %s980_s21  ;;  %s40_s15 = ssub.s32 %s996_s25, %s1285_s12 }
  0x16   : > { %p752_p11 = scmp.lt.s32.totalorder %s1000_s26, 2  ;;  %p42_p12 = scmp.eq.s32.totalorder %s40_s15, 0 }
  0x17   : > { %p1111_p13 = por %p58_p1, %p57_p10  ;;  %s240_s17 = sand.u32 1, %s988_s23  }
  0x18   : > { %s726_s18 = sshll.u32 %s996_s25, 5  ;;  %s710_s20 = sshll.u32 %s240_s17, 5 }
  0x19   : > { %s1118_s19 = scalar_select %p42_p12, %s988_s23, %s44_s13  }
  0x1a   : > { %s251_s30 = scalar_lea.hbm %s1256_s0, %s726_s18  ;;  %s244_s8 = scalar_lea.vmem [#allocation4], %s710_s20 }
  0x1b   : > { %1274 = sst [smem:[#allocation17_spill]] %s1118_s19  ;;  %s253_s21 = sshll.u32 %s251_s30, 4  ;;  %s254_s21 = int_to_ptr.hbm [resolvable:$true] %s253_s21 }
  0x1c   : > { %s255_s9 = sshll.u32 %s244_s8, 4  ;;  %p745_p0 = pnand %p752_p11, %p1100_p9  ;;  %s256_s9 = int_to_ptr.vmem [resolvable:$true] %s255_s9 }
  0x1d   : > { %s713_s15 = sshll.u32 %s240_s17, 9  ;;  %s727_s10 = sshll.u32 %s996_s25, 9 }
  0x1e   : > { %s266_s11 = scalar_lea.vmem [#allocation7], %s713_s15  ;;  %s241_s13 = scalar_lea.sflag [#allocation5], %s240_s17 }
  0x1f   : > { %s274_s4 = sshll.u32 %s266_s11, 4  ;;  %s262_s12 = sand.u32 1, %s1000_s26   ;;  %s275_s4 = int_to_ptr.vmem [resolvable:$true] %s274_s4 }
  0x20   : > { %747 = dma.hbm_to_vmem [thread:$0]  (!%p745_p0), %s254_s21, 512, %s256_s9, %s241_s13  }
  0x21   : > { %s271_s18 = scalar_lea.hbm %s1257_s1, %s727_s10  ;;  %s263_s20 = scalar_lea.sflag [#allocation8], %s262_s12 }
  0x22   : > { %s272_s28 = sshll.u32 %s271_s18, 4  ;;  %s1275_s29 = smov 8   ;;  %s273_s28 = int_to_ptr.hbm [resolvable:$true] %s272_s28 }
  0x23   : > { %s1276_s30 = smov 128   ;;  %286 = sbr.rel (%p1082_p3) target bundleno = 759 (0x2f7), region = 44 }
  0x24   : > { %750 = dma.hbm_to_vmem [thread:$0]  (!%p745_p0), %s273_s28, 8192, %s275_s4, %s263_s20, %s1276_s30, %s1276_s30, %s1275_s29  }
  0x25   : > { %s288_s11 = sand.u32 (!%p1082_p3), 1, %s984_s22  }
  0x26   : > { %s717_s14 = sshll.u32 (!%p1082_p3), %s288_s11, 5  ;;  %s289_s17 = scalar_lea.sflag (!%p1082_p3), [#allocation5], %s288_s11 }
  0x27   : > { %s1138_s21 = scalar_lea.vmem (!%p1082_p3), [#allocation4], %s717_s14 }
  0x28   : > { %963 = dma.done.wait (%p1111_p13), %s289_s17, 512  }
  0x29   : > { %965 = vsyncadd (%p1111_p13), %s289_s17, 4294966784  ;;  %s298_s23 = sand.u32 1, %s1074_s27   ;;  %s718_s10 = sshll.u32 %s288_s11, 9 }
  0x2a   : > { %s299_s4 = scalar_lea.sflag [#allocation8], %s298_s23  ;;  %s1145_s12 = scalar_lea.vmem [#allocation7], %s718_s10 }
  0x2b   : > { %967 = dma.done.wait (%p1111_p13), %s299_s4, 8192  }
  0x2c   : > { %969 = vsyncadd (%p1111_p13), %s299_s4, 4294959104 }
  0x2d   : > { %971 = dma.done.wait (%p58_p1), [#allocation8], 2048  }
  0x2e   : > { %973 = vsyncadd (%p58_p1), [#allocation8], 4294965248  ;;  %p720_p2 = scmp.ne.s32.totalorder %s992_s24, 0 }
  0x30   : > { %342 = sbr.rel (%p720_p2) target bundleno = 56 (0x38), region = 60 }
  0x35   : > { %vm344_vm0 = vcmask 7168   ;;  %v1005_v0 = vmov 0.0  }
  0x36   : > { %343 = vst [vmem:[#allocation2] sm:$0xff] %v1005_v0 }
  0x37   : > { %345 = vst.msk [vmem:[#allocation3] sm:$0xff] %vm344_vm0, %v1005_v0 }
  0x38 PF: > { %v398_v1 = vld [vmem:[%s1145_s12 + $0x178] sm:$0xff]  ;;  %v397_v2 = vld [vmem:[%s1145_s12 + $0x170] sm:$0xff]  ;;  %v396_v6 = vld [vmem:[%s1145_s12 + $0x168] sm:$0xff]  ;;  %vm508_vm1 = vcmask 7168   ;;  %p721_p1 = scmp.ne.s32.totalorder %s992_s24, 1 }
  0x39   : > { %v414_v3 = vld [vmem:[%s1145_s12 + $0x1f8] sm:$0xff]  ;;  %455 = vmatpush.msra.mxu2 %v398_v1  ;;  %v413_v7 = vld [vmem:[%s1145_s12 + $0x1f0] sm:$0xff]  ;;  %v412_v10 = vld [vmem:[%s1145_s12 + $0x1e8] sm:$0xff] }
  0x3a   : > { %475 = vmatpush.msra.mxu3 %v414_v3  ;;  %v366_v4 = vld [vmem:[%s1145_s12 + $0x78] sm:$0xff]  ;;  %v365_v8 = vld [vmem:[%s1145_s12 + $0x70] sm:$0xff]  ;;  %v364_v11 = vld [vmem:[%s1145_s12 + $0x68] sm:$0xff] }
  0x3b   : > { %v382_v5 = vld [vmem:[%s1145_s12 + $0xf8] sm:$0xff]  ;;  %415 = vmatpush.msra.mxu0 %v366_v4  ;;  %v381_v9 = vld [vmem:[%s1145_s12 + $0xf0] sm:$0xff]  ;;  %456 = vmatpush.msra.mxu2 %v397_v2  ;;  %v395_v12 = vld [vmem:[%s1145_s12 + $0x160] sm:$0xff] }
  0x3c   : > { %435 = vmatpush.msra.mxu1 %v382_v5  ;;  %476 = vmatpush.msra.mxu3 %v413_v7  ;;  %v380_v13 = vld [vmem:[%s1145_s12 + $0xe8] sm:$0xff]  ;;  %v411_v14 = vld [vmem:[%s1145_s12 + $0x1e0] sm:$0xff]  ;;  %v394_v17 = vld [vmem:[%s1145_s12 + $0x158] sm:$0xff] }
  0x3d   : > { %416 = vmatpush.msra.mxu0 %v365_v8  ;;  %457 = vmatpush.msra.mxu2 %v396_v6  ;;  %v363_v15 = vld [vmem:[%s1145_s12 + $0x60] sm:$0xff]  ;;  %v410_v18 = vld [vmem:[%s1145_s12 + $0x1d8] sm:$0xff]  ;;  %v393_v21 = vld [vmem:[%s1145_s12 + $0x150] sm:$0xff] }
  0x3e   : > { %436 = vmatpush.msra.mxu1 %v381_v9  ;;  %477 = vmatpush.msra.mxu3 %v412_v10  ;;  %v379_v16 = vld [vmem:[%s1145_s12 + $0xe0] sm:$0xff]  ;;  %v362_v19 = vld [vmem:[%s1145_s12 + $0x58] sm:$0xff]  ;;  %v409_v22 = vld [vmem:[%s1145_s12 + $0x1d0] sm:$0xff] }
  0x3f   : > { %417 = vmatpush.msra.mxu0 %v364_v11  ;;  %458 = vmatpush.msra.mxu2 %v395_v12  ;;  %v378_v20 = vld [vmem:[%s1145_s12 + $0xd8] sm:$0xff]  ;;  %v361_v23 = vld [vmem:[%s1145_s12 + $0x50] sm:$0xff]  ;;  %v392_v25 = vld [vmem:[%s1145_s12 + $0x148] sm:$0xff] }
  0x40   : > { %437 = vmatpush.msra.mxu1 %v380_v13  ;;  %478 = vmatpush.msra.mxu3 %v411_v14  ;;  %v377_v24 = vld [vmem:[%s1145_s12 + $0xd0] sm:$0xff]  ;;  %v408_v26 = vld [vmem:[%s1145_s12 + $0x1c8] sm:$0xff]  ;;  %v391_v29 = vld [vmem:[%s1145_s12 + $0x140] sm:$0xff] }
  0x41   : > { %418 = vmatpush.msra.mxu0 %v363_v15  ;;  %459 = vmatpush.msra.mxu2 %v394_v17  ;;  %v360_v27 = vld [vmem:[%s1145_s12 + $0x48] sm:$0xff]  ;;  %v407_v30 = vld [vmem:[%s1145_s12 + $0x1c0] sm:$0xff]  ;;  %v390_v33 = vld [vmem:[%s1145_s12 + $0x138] sm:$0xff] }
  0x42   : > { %438 = vmatpush.msra.mxu1 %v379_v16  ;;  %479 = vmatpush.msra.mxu3 %v410_v18  ;;  %v376_v28 = vld [vmem:[%s1145_s12 + $0xc8] sm:$0xff]  ;;  %v359_v31 = vld [vmem:[%s1145_s12 + $0x40] sm:$0xff]  ;;  %v406_v34 = vld [vmem:[%s1145_s12 + $0x1b8] sm:$0xff] }
  0x43   : > { %419 = vmatpush.msra.mxu0 %v362_v19  ;;  %460 = vmatpush.msra.mxu2 %v393_v21  ;;  %v375_v32 = vld [vmem:[%s1145_s12 + $0xc0] sm:$0xff]  ;;  %v358_v35 = vld [vmem:[%s1145_s12 + $0x38] sm:$0xff]  ;;  %v389_v37 = vld [vmem:[%s1145_s12 + $0x130] sm:$0xff] }
  0x44   : > { %439 = vmatpush.msra.mxu1 %v378_v20  ;;  %480 = vmatpush.msra.mxu3 %v409_v22  ;;  %v374_v36 = vld [vmem:[%s1145_s12 + $0xb8] sm:$0xff]  ;;  %v405_v38 = vld [vmem:[%s1145_s12 + $0x1b0] sm:$0xff]  ;;  %v388_v41 = vld [vmem:[%s1145_s12 + $0x128] sm:$0xff] }
  0x45   : > { %420 = vmatpush.msra.mxu0 %v361_v23  ;;  %461 = vmatpush.msra.mxu2 %v392_v25  ;;  %v357_v39 = vld [vmem:[%s1145_s12 + $0x30] sm:$0xff]  ;;  %v404_v42 = vld [vmem:[%s1145_s12 + $0x1a8] sm:$0xff]  ;;  %v387_v45 = vld [vmem:[%s1145_s12 + $0x120] sm:$0xff] }
  0x46   : > { %440 = vmatpush.msra.mxu1 %v377_v24  ;;  %481 = vmatpush.msra.mxu3 %v408_v26  ;;  %v373_v40 = vld [vmem:[%s1145_s12 + $0xb0] sm:$0xff]  ;;  %v356_v43 = vld [vmem:[%s1145_s12 + $0x28] sm:$0xff]  ;;  %v386_v46 = vld [vmem:[%s1145_s12 + $0x118] sm:$0xff] }
  0x47   : > { %421 = vmatpush.msra.mxu0 %v360_v27  ;;  %462 = vmatpush.msra.mxu2 %v391_v29  ;;  %v372_v44 = vld [vmem:[%s1145_s12 + $0xa8] sm:$0xff]  ;;  %v403_v47 = vld [vmem:[%s1145_s12 + $0x1a0] sm:$0xff]  ;;  %v402_v50 = vld [vmem:[%s1145_s12 + $0x198] sm:$0xff] }
  0x48   : > { %441 = vmatpush.msra.mxu1 %v376_v28  ;;  %482 = vmatpush.msra.mxu3 %v407_v30  ;;  %v355_v48 = vld [vmem:[%s1145_s12 + $0x20] sm:$0xff]  ;;  %v348_v51 = vld [vmem:[%s1138_s21 + $0x10] sm:$0xff]  ;;  %v347_v53 = vld [vmem:[%s1138_s21 + $0x8] sm:$0xff] }
  0x49   : > { %422 = vmatpush.msra.mxu0 %v359_v31  ;;  %463 = vmatpush.msra.mxu2 %v390_v33  ;;  %v371_v49 = vld [vmem:[%s1145_s12 + $0xa0] sm:$0xff]  ;;  %v354_v54 = vld [vmem:[%s1145_s12 + $0x18] sm:$0xff]  ;;  %v500_v56 = vmul.f32 %v348_v51, %v348_v51  ;;  %v499_v58 = vmul.f32 %v347_v53, %v347_v53  ;;  %v385_v59 = vld [vmem:[%s1145_s12 + $0x110] sm:$0xff] }
  0x4a   : > { %442 = vmatpush.msra.mxu1 %v375_v32  ;;  %483 = vmatpush.msra.mxu3 %v406_v34  ;;  %v346_v52 = vld [vmem:[%s1138_s21] sm:$0xff]  ;;  %v370_v55 = vld [vmem:[%s1145_s12 + $0x98] sm:$0xff]  ;;  %v401_v60 = vld [vmem:[%s1145_s12 + $0x190] sm:$0xff] }
  0x4b   : > { %423 = vmatpush.msra.mxu0 %v358_v35  ;;  %464 = vmatpush.msra.mxu2 %v389_v37  ;;  %v498_v57 = vmul.f32 %v346_v52, %v346_v52  ;;  %v353_v61 = vld [vmem:[%s1145_s12 + $0x10] sm:$0xff]  ;;  %v384_v0 = vld [vmem:[%s1145_s12 + $0x108] sm:$0xff]  ;;  %v349_v2 = vld [vmem:[%s1138_s21 + $0x18] sm:$0xff] }
  0x4c   : > { %443 = vmatpush.msra.mxu1 %v374_v36  ;;  %484 = vmatpush.msra.mxu3 %v405_v38  ;;  %v369_v62 = vld [vmem:[%s1145_s12 + $0x90] sm:$0xff]  ;;  %v400_v1 = vld [vmem:[%s1145_s12 + $0x188] sm:$0xff]  ;;  %v501_v5 = vmul.f32 %v349_v2, %v349_v2  ;;  %v383_v7 = vld [vmem:[%s1145_s12 + $0x100] sm:$0xff] }
  0x4d   : > { %424 = vmatpush.msra.mxu0 %v357_v39  ;;  %465 = vmatpush.msra.mxu2 %v388_v41  ;;  %v502_v63 = vadd.f32 %v499_v58, %v498_v57  ;;  %v352_v3 = vld [vmem:[%s1145_s12 + $0x8] sm:$0xff]  ;;  %v399_v8 = vld [vmem:[%s1145_s12 + $0x180] sm:$0xff]  ;;  %v497_v12 = vld [vmem:[#allocation3] sm:$0xff] }
  0x4e   : > { %444 = vmatpush.msra.mxu1 %v373_v40  ;;  %485 = vmatpush.msra.mxu3 %v404_v42  ;;  %v368_v4 = vld [vmem:[%s1145_s12 + $0x88] sm:$0xff]  ;;  %v351_v9 = vld [vmem:[%s1145_s12] sm:$0xff]  ;;  %v350_v21 = vld [vmem:[#allocation2] sm:$0xff] }
  0x4f   : > { %425 = vmatpush.msra.mxu0 %v356_v43  ;;  %466 = vmatpush.msra.mxu2 %v387_v45  ;;  %v503_v6 = vadd.f32 %v502_v63, %v500_v56  ;;  %v367_v10 = vld [vmem:[%s1145_s12 + $0x80] sm:$0xff] }
  0x50   : > { %445 = vmatpush.msra.mxu1 %v372_v44  ;;  %486 = vmatpush.msra.mxu3 %v403_v47 }
  0x51   : > { %426 = vmatpush.msra.mxu0 %v355_v48  ;;  %467 = vmatpush.msra.mxu2 %v386_v46  ;;  %v504_v11 = vadd.f32 %v503_v6, %v501_v5 }
  0x52   : > { %446 = vmatpush.msra.mxu1 %v371_v49  ;;  %487 = vmatpush.msra.mxu3 %v402_v50 }
  0x53   : > { %427 = vmatpush.msra.mxu0 %v354_v54  ;;  %468 = vmatpush.msra.mxu2 %v385_v59 }
  0x54   : > { %447 = vmatpush.msra.mxu1 %v370_v55  ;;  %488 = vmatpush.msra.mxu3 %v401_v60 }
  0x55   : > { %428 = vmatpush.msra.mxu0 %v353_v61  ;;  %469 = vmatpush.msra.mxu2 %v384_v0 }
  0x56   : > { %448 = vmatpush.msra.mxu1 %v369_v62  ;;  %489 = vmatpush.msra.mxu3 %v400_v1 }
  0x57   : > { %429 = vmatpush.msra.mxu0 %v352_v3  ;;  %470 = vmatpush.msra.mxu2 %v383_v7 }
  0x58   : > { %449 = vmatpush.msra.mxu1 %v368_v4  ;;  %490 = vmatpush.msra.mxu3 %v399_v8 }
  0x59   : > { %471 = vmatmul.f32.vlgmr.msra.gmra.mxu2 %v348_v51  ;;  %491 = vmatmul.f32.vlgmr.msra.gmra.mxu3 %v349_v2 }
  0x5a   : > { %430 = vmatpush.msra.mxu0 %v351_v9  ;;  %450 = vmatpush.msra.mxu1 %v367_v10 }
  0x5b   : > { %431 = vmatmul.f32.vlgmr.msra.gmra.mxu0 %v346_v52  ;;  %451 = vmatmul.f32.vlgmr.msra.gmra.mxu1 %v347_v53 }
  0x5c   : > { %505 = vadd.xlane.f32.xlu0 %v504_v11 }
  0xcf   : > { %v506_v13 = vpop.xlane.xlu0 %505 }
  0xd0   : > { %v507_v14 = vadd.f32 %v506_v13, %v497_v12 }
  0xd2   : > { %509 = vst.msk [vmem:[#allocation3] sm:$0xff] %vm508_vm1, %v507_v14 }
  0xd8   : > { %v432_v15 = vpop.f32.mrf.mxu0  ;;  %v452_v16 = vpop.f32.mrf.mxu1 }
  0xd9   : > { %v453_v17 = vadd.f32 %v452_v16, %v432_v15 }
  0xdc   : > { %v472_v18 = vpop.f32.mrf.mxu2  ;;  %v492_v19 = vpop.f32.mrf.mxu3 }
  0xdd   : > { %v473_v20 = vadd.f32 %v472_v18, %v453_v17 }
  0xdf   : > { %v493_v22 = vadd.f32 %v492_v19, %v473_v20  ;;  %513 = sbr.rel (%p721_p1) target bundleno = 753 (0x2f1), region = 64 }
  0xe1   : > { %v495_v23 = vadd.f32 %v493_v22, %v350_v21 }
  0xe3   : > { %496 = vst [vmem:[#allocation2] sm:$0xff] %v495_v23 }
  0xe4   : > { %v516_v24 = vld [vmem:[#allocation3] sm:$0xff]  ;;  %v550_v26 = vld [vmem:[#allocation9 + $0x70] sm:$0xff]  ;;  %v1006_v27 = vmov 0   ;;  %v549_v28 = vld [vmem:[#allocation9 + $0x68] sm:$0xff] }
  0xe5   : > { %v551_v25 = vld [vmem:[#allocation9 + $0x78] sm:$0xff]  ;;  %810 = vset.pattern.permute.xlu0 %v1006_v27  ;;  %v548_v29 = vld [vmem:[#allocation9 + $0x60] sm:$0xff]  ;;  %v546_v31 = vld [vmem:[#allocation9 + $0x50] sm:$0xff] }
  0xe6   : > { %556 = vmatpush.msra.mxu0 %v551_v25  ;;  %519 = vperm.xlu0 %810, %v516_v24   ;;  %v547_v30 = vld [vmem:[#allocation9 + $0x58] sm:$0xff]  ;;  %v545_v32 = vld [vmem:[#allocation9 + $0x48] sm:$0xff]  ;;  %v544_v33 = vld [vmem:[#allocation9 + $0x40] sm:$0xff] }
  0xe7   : > { %v543_v34 = vld [vmem:[#allocation9 + $0x38] sm:$0xff]  ;;  %v542_v35 = vld [vmem:[#allocation9 + $0x30] sm:$0xff]  ;;  %v541_v36 = vld [vmem:[#allocation9 + $0x28] sm:$0xff] }
  0xe8   : > { %557 = vmatpush.msra.mxu0 %v550_v26  ;;  %v540_v37 = vld [vmem:[#allocation9 + $0x20] sm:$0xff]  ;;  %v539_v38 = vld [vmem:[#allocation9 + $0x18] sm:$0xff]  ;;  %v538_v39 = vld [vmem:[#allocation9 + $0x10] sm:$0xff] }
  0xe9   : > { %v537_v40 = vld [vmem:[#allocation9 + $0x8] sm:$0xff]  ;;  %v536_v41 = vld [vmem:[#allocation9] sm:$0xff]  ;;  %v811_v43 = vld [vmem:[%s1258_s2] ss:$0 sm:$0xff] }
  0xea   : > { %558 = vmatpush.msra.mxu0 %v549_v28  ;;  %v526_v42 = vld [vmem:[#allocation2] sm:$0xff] }
  0xeb   : > { %v527_v44 = vmul.f32 2.0, %v526_v42  ;;  %v812_v48 = vld [vmem:[%s1259_s3] ss:$0 sm:$0xff] }
  0xec   : > { %559 = vmatpush.msra.mxu0 %v548_v29  ;;  %v813_v53 = vld [vmem:[%s1261_s5] ss:$0 sm:$0xff] }
  0xee   : > { %560 = vmatpush.msra.mxu0 %v547_v30 }
  0xf0   : > { %561 = vmatpush.msra.mxu0 %v546_v31 }
  0xf2   : > { %562 = vmatpush.msra.mxu0 %v545_v32 }
  0xf4   : > { %563 = vmatpush.msra.mxu0 %v544_v33 }
  0xf6   : > { %564 = vmatpush.msra.mxu0 %v543_v34 }
  0xf8   : > { %565 = vmatpush.msra.mxu0 %v542_v35 }
  0xfa   : > { %566 = vmatpush.msra.mxu0 %v541_v36 }
  0xfc   : > { %567 = vmatpush.msra.mxu0 %v540_v37 }
  0xfe   : > { %568 = vmatpush.msra.mxu0 %v539_v38 }
 0x100   : > { %569 = vmatpush.msra.mxu0 %v538_v39 }
 0x102   : > { %570 = vmatpush.msra.mxu0 %v537_v40 }
 0x104   : > { %571 = vmatpush.msra.mxu0 %v536_v41 }
 0x158   : > { %v520_v45 = vpop.permute.xlu0 %519 }
 0x159   : > { %v525_v46 = vadd.f32 %v811_v43, %v520_v45 }
 0x15b   : > { %v528_v47 = vsub.f32 %v525_v46, %v527_v44 }
 0x15d   : > { %v529_v49 = vmax.f32 %v528_v47, 0.0 }
 0x15f   : > { %v533_v50 = vmul.f32 %v812_v48, %v529_v49 }
 0x161   : > { %v534_v51 = vmul.f32 1.442695, %v533_v50 }
 0x163   : > { %814 = vpow2.f32 %v534_v51 }
 0x169   : > { %v815_v52 = vpop.eup %814 }
 0x16a   : > { %572 = vmatmul.f32.vlgmr.msra.gmra.mxu0 %v815_v52 }
 0x1e7   : > { %v573_v54 = vpop.f32.mrf.mxu0 }
 0x1e8   : > { %v574_v55 = vadd.f32 %v813_v53, %v573_v54 }
 0x1ea   : > { %576 = vmax.xlane.f32.xlu0 %v574_v55 }
 0x25d   : > { %v577_v56 = vpop.xlane.xlu0 %576 }
 0x25e   : > { %v578_v57 = vsub.f32 %v574_v55, %v577_v56 }
 0x260   : > { %v579_v58 = vmul.f32 1.442695, %v578_v57 }
 0x262   : > { %816 = vpow2.f32 %v579_v58 }
 0x268   : > { %v817_v59 = vpop.eup %816 }
 0x269   : > { %581 = vadd.xlane.f32.xlu1 %v817_v59 }
 0x2dc   : > { %v582_v60 = vpop.xlane.xlu1 %581 }
 0x2dd   : > { %818 = vrcp.f32 %v582_v60  ;;  %v594_v0 = vand.u32 2147483648, %v582_v60  ;;  %v592_v2 = vand.u32 2147483647, %v582_v60  ;;  %vm588_vm3 = vweird.f32 %v582_v60 }
 0x2df   : > { %v595_v4 = vor.u32 1.1754944e-38, %v594_v0  ;;  %vm593_vm5 = vcmp.eq.f32.partialorder %v592_v2, 8.507059e+37 }
 0x2e3   : > { %v819_v61 = vpop.eup %818 }
 0x2e4   : > { %v584_v62 = vmul.f32 %v819_v61, %v582_v60  ;;  %vm589_vm2 = vweird.f32 %v819_v61 }
 0x2e5   : > { %vm590_vm4 = vmor %vm588_vm3, %vm589_vm2 }
 0x2e6   : > { %v585_v63 = vsub.f32 1.0, %v584_v62 }
 0x2e8   : > { %v586_v1 = vmul.f32 %v819_v61, %v585_v63 }
 0x2ea   : > { %v587_v3 = vadd.f32 %v819_v61, %v586_v1 }
 0x2ec   : > { %v591_v5 = vsel %vm590_vm4, %v819_v61, %v587_v3 }
 0x2ed   : > { %v596_v6 = vsel %vm593_vm5, %v595_v4, %v591_v5 }
 0x2ee   : > { %v597_v7 = vmul.f32 %v817_v59, %v596_v6 }
 0x2f0   : > { %598 = vst [vmem:[#allocation10] sm:$0xff] %v597_v7 }
 0x2f1 PF: > { %p754_p3 = scmp.eq.s32.totalorder %s1074_s27, 1  ;;  %s609_s18 = sshll.u32 %s1262_s6, 4  ;;  %s610_s18 = int_to_ptr.hbm [resolvable:$true] %s609_s18 }
 0x2f2   : > { %s1007_s28 = smov [#allocation10]  }
 0x2f3   : > { %s607_s20 = sshll.u32 %s1007_s28, 4  ;;  %s608_s20 = int_to_ptr.vmem [resolvable:$true] %s607_s20 }
 0x2f4   : > { %737 = dma.vmem_to_hbm [thread:$0]  (%p754_p3), %s608_s20, 128, %s610_s18, [#allocation6]  }
 0x2f5   : > { %975 = dma.done.wait (%p754_p3), [#allocation6], 128  }
 0x2f6   : > { %977 = vsyncadd (%p754_p3), [#allocation6], 4294967168 }
 0x2f7 PF: > { %s23_s26 = sadd.s32 1, %s1000_s26   ;;  %s1277_s29 = sld [smem:[#allocation15_spill]] }
 0x2f8   : > { %p20_p4 = scmp.ge.s32.totalorder %s23_s26, 4   ;;  %s1278_s23 = sld [smem:[#allocation17_spill]] }
 0x2f9   : > { %s1279_s27 = sld [smem:[#allocation16_spill]]  ;;  %s1280_s21 = smov %s984_s22 }
 0x2fa   : > { %s1282_s24 = smov %s996_s25 }
 0x2fb   :  { %22 = sbr.rel (!%p20_p4) target bundleno = 9 (0x9), region = 107 }
 0x2fd   : > { %s1281_s22 = smov %s1277_s29 }
 0x2ff   : > { %s1283_s25 = smov %s1279_s27 }
 0x300   :  { %623 = vsyncpa [#allocation5], 1 }
 0x301   :  { %625 = vsyncpa [#allocation5 + $0x1], 1 }
 0x302   :  { %626 = vsyncpa [#allocation8], 1 }
 0x303   :  { %628 = vsyncpa [#allocation8 + $0x1], 1 }
 0x304   :  { %629 = vsyncpa [#allocation6], 1 }
 0x305   :  { %631 = vsyncpa [#allocation6 + $0x1], 1 }

</bundles_post_ra>
